<compile_context>
chip_gen: v5e
topology: v5e:2x2
jax: 0.10.0
libtpu: 0.0.40
codegen_flags: <defaults>
</compile_context>

<pallas_src>
import functools

import jax
import jax.numpy as jnp
from jax.experimental import pallas as pl
from jax.experimental.pallas import tpu as pltpu

_INV_SQRT2 = 0.7071067811865476


def _round_up(x, n):
    return ((x + n - 1) // n) * n


def _erf_approx(z):
    # Abramowitz & Stegun 7.1.26, max abs error ~1.5e-7. erf is odd.
    a1, a2, a3, a4, a5 = (0.254829592, -0.284496736, 1.421413741,
                          -1.453152027, 1.061405429)
    p = 0.3275911
    sgn = jnp.where(z < 0.0, -1.0, 1.0)
    za = jnp.abs(z)
    t = 1.0 / (1.0 + p * za)
    poly = ((((a5 * t + a4) * t + a3) * t + a2) * t + a1) * t
    return sgn * (1.0 - poly * jnp.exp(-za * za))


def _gelu_exact(x):
    # Matches PyTorch nn.GELU() default (erf-based), not the tanh approximation.
    return 0.5 * x * (1.0 + _erf_approx(x * _INV_SQRT2))


def _discriminator_kernel(x_ref, l_ref, w1x_ref, w1l_ref, b1_ref,
                          w2_ref, b2_ref, o_ref):
    # x tile: (tm, dim); label tile: (tm, n_class)
    x = x_ref[...].astype(jnp.float32)
    lab = l_ref[...].astype(jnp.float32)

    # fc1 on the (virtual) concatenated input:
    #   concat([x, label], 1) @ W1^T + b1 == x @ W1x + label @ W1l + b1
    h = (jnp.dot(x, w1x_ref[...], preferred_element_type=jnp.float32)
         + jnp.dot(lab, w1l_ref[...], preferred_element_type=jnp.float32)
         + b1_ref[...])

    h = _gelu_exact(h)

    # fc2: (tm, hid_p) -> (tm, 1).  N=1 is a degenerate MXU shape; compute it
    # as a VPU multiply + XLU lane reduction.  Padded hidden lanes carry
    # w2 == 0, so they contribute nothing.
    out = jnp.sum(h * w2_ref[...], axis=-1, keepdims=True) + b2_ref[...]

    # Dropout(p=0.0) -> identity.
    o_ref[...] = out.astype(o_ref.dtype)


@functools.partial(jax.jit, static_argnames=("tm",))
def discriminator_pallas(x, label, w1, b1, w2, b2, *, tm=512):
    """x: (B, dim); label: (B, 1, n_class); weights in PyTorch (out, in) layout."""
    bsz, dim = x.shape
    lab = label.reshape(bsz, -1)          # == label.squeeze(1)
    n_class = lab.shape[1]
    hid = w1.shape[0]
    assert w1.shape == (hid, dim + n_class)
    assert w2.shape == (1, hid)

    # Weight prep (tiny, fused into the jit): transpose for `x @ W`, split the
    # fc1 weight along its input axis, and zero-pad the hidden (lane) axis to
    # a multiple of 128 for clean, unmasked MXU/VPU shapes inside the kernel.
    hid_p = _round_up(hid, 128)
    pad_h = ((0, 0), (0, hid_p - hid))
    w1_t = w1.T.astype(jnp.float32)                               # (dim+n_class, hid)
    w1x = jnp.pad(w1_t[:dim, :], pad_h)                           # (dim, hid_p)
    w1l = jnp.pad(w1_t[dim:, :], pad_h)                           # (n_class, hid_p)
    b1r = jnp.pad(b1.reshape(1, hid).astype(jnp.float32), pad_h)  # (1, hid_p)
    w2r = jnp.pad(w2.reshape(1, hid).astype(jnp.float32), pad_h)  # (1, hid_p)
    b2r = b2.reshape(1, 1).astype(jnp.float32)                    # (1, 1)

    # Row tiling: big tile, pad the batch instead of asserting divisibility.
    m = bsz
    tm_eff = _round_up(max(8, min(tm, _round_up(m, 8))), 8)
    m_pad = _round_up(m, tm_eff)
    if m_pad != m:
        x = jnp.pad(x, ((0, m_pad - m), (0, 0)))
        lab = jnp.pad(lab, ((0, m_pad - m), (0, 0)))

    grid = (m_pad // tm_eff,)

    out = pl.pallas_call(
        _discriminator_kernel,
        out_shape=jax.ShapeDtypeStruct((m_pad, 1), x.dtype),
        grid=grid,
        in_specs=[
            pl.BlockSpec((tm_eff, dim), lambda i: (i, 0)),       # x rows
            pl.BlockSpec((tm_eff, n_class), lambda i: (i, 0)),   # label rows
            pl.BlockSpec((dim, hid_p), lambda i: (0, 0)),        # W1 (x part)
            pl.BlockSpec((n_class, hid_p), lambda i: (0, 0)),    # W1 (label part)
            pl.BlockSpec((1, hid_p), lambda i: (0, 0)),          # b1
            pl.BlockSpec((1, hid_p), lambda i: (0, 0)),          # W2 (row vector)
            pl.BlockSpec((1, 1), lambda i: (0, 0)),              # b2
        ],
        out_specs=pl.BlockSpec((tm_eff, 1), lambda i: (i, 0)),
        compiler_params=pltpu.CompilerParams(
            dimension_semantics=("parallel",)),
    )(x, lab, w1x, w1l, b1r, w2r, b2r)

    return out[:m]


def discriminator_reference(x, label, w1, b1, w2, b2):
    """Pure-JAX port of the PyTorch forward for verification."""
    xcat = jnp.concatenate([x, jnp.squeeze(label, axis=1)], axis=1)
    h = xcat @ w1.T + b1
    h = jax.nn.gelu(h, approximate=False)     # nn.GELU() default (exact, erf)
    return h @ w2.T + b2                      # Dropout(p=0.0) is identity


if __name__ == "__main__":
    DIM = 11
    N_CLASS = 6
    HID = DIM + N_CLASS
    B = 2

    key = jax.random.PRNGKey(0)
    kx, kl, kw1, kb1, kw2, kb2 = jax.random.split(key, 6)

    x = jax.random.normal(kx, (B, DIM), dtype=jnp.float32)
    label = jax.random.normal(kl, (B, 1, N_CLASS), dtype=jnp.float32)

    # Deterministic synthetic parameters (PyTorch Linear layout: (out, in)).
    w1 = jax.random.normal(kw1, (HID, HID), dtype=jnp.float32) * 0.2
    b1 = jax.random.normal(kb1, (HID,), dtype=jnp.float32) * 0.1
    w2 = jax.random.normal(kw2, (1, HID), dtype=jnp.float32) * 0.2
    b2 = jax.random.normal(kb2, (1,), dtype=jnp.float32) * 0.1

    out = discriminator_pallas(x, label, w1, b1, w2, b2)
    out = jax.block_until_ready(out)

    ref = discriminator_reference(x, label, w1, b1, w2, b2)
    assert out.shape == (B, 1), out.shape
    assert jnp.allclose(out, ref, atol=1e-4, rtol=1e-4), \
        float(jnp.max(jnp.abs(out - ref)))

    print("KERNEL_OK")
</pallas_src>

<mosaic_0001>
module attributes {stable_mosaic.version = 11 : i64} {
  func.func @_discriminator_kernel(%arg0: i32, %arg1: memref<8x11xf32, #tpu.memory_space<vmem>>, %arg2: memref<8x6xf32, #tpu.memory_space<vmem>>, %arg3: memref<11x128xf32, #tpu.memory_space<vmem>>, %arg4: memref<6x128xf32, #tpu.memory_space<vmem>>, %arg5: memref<1x128xf32, #tpu.memory_space<vmem>>, %arg6: memref<1x128xf32, #tpu.memory_space<vmem>>, %arg7: memref<1x1xf32, #tpu.memory_space<vmem>>, %arg8: memref<8x1xf32, #tpu.memory_space<vmem>>) attributes {dimension_semantics = [#tpu.dimension_semantics<parallel>], iteration_bounds = array<i64: 1>, scalar_prefetch = 0 : i64, scratch_operands = 0 : i64, tpu.core_type = #tpu.core_type<tc>, window_params = [{transform_indices = @transform_0, window_bounds = array<i64: 8, 11>}, {transform_indices = @transform_1, window_bounds = array<i64: 8, 6>}, {pipeline_mode = #tpu.pipeline_mode<synchronous>, transform_indices = @transform_2, window_bounds = array<i64: 11, 128>}, {pipeline_mode = #tpu.pipeline_mode<synchronous>, transform_indices = @transform_3, window_bounds = array<i64: 6, 128>}, {pipeline_mode = #tpu.pipeline_mode<synchronous>, transform_indices = @transform_4, window_bounds = array<i64: 1, 128>}, {pipeline_mode = #tpu.pipeline_mode<synchronous>, transform_indices = @transform_5, window_bounds = array<i64: 1, 128>}, {pipeline_mode = #tpu.pipeline_mode<synchronous>, transform_indices = @transform_6, window_bounds = array<i64: 1, 1>}, {transform_indices = @transform_7, window_bounds = array<i64: 8, 1>}]} {
    %c0 = arith.constant 0 : index
    %c0_0 = arith.constant 0 : index
    %0 = vector.load %arg1[%c0, %c0_0] : memref<8x11xf32, #tpu.memory_space<vmem>>, vector<8x11xf32>
    %c0_1 = arith.constant 0 : index
    %c0_2 = arith.constant 0 : index
    %1 = vector.load %arg2[%c0_1, %c0_2] : memref<8x6xf32, #tpu.memory_space<vmem>>, vector<8x6xf32>
    %c0_3 = arith.constant 0 : index
    %c0_4 = arith.constant 0 : index
    %2 = vector.load %arg3[%c0_3, %c0_4] : memref<11x128xf32, #tpu.memory_space<vmem>>, vector<11x128xf32>
    %cst = arith.constant dense<0.000000e+00> : vector<8x128xf32>
    %3 = tpu.matmul %0, %2, %cst {dimension_numbers = #tpu.dot_dimension_numbers<[1], [0], [0], [1], [0, 0, 1, 1], [], []>} : vector<8x11xf32>, vector<11x128xf32>, vector<8x128xf32> -> vector<8x128xf32>
    %c0_5 = arith.constant 0 : index
    %c0_6 = arith.constant 0 : index
    %4 = vector.load %arg4[%c0_5, %c0_6] : memref<6x128xf32, #tpu.memory_space<vmem>>, vector<6x128xf32>
    %cst_7 = arith.constant dense<0.000000e+00> : vector<8x128xf32>
    %5 = tpu.matmul %1, %4, %cst_7 {dimension_numbers = #tpu.dot_dimension_numbers<[1], [0], [0], [1], [0, 0, 1, 1], [], []>} : vector<8x6xf32>, vector<6x128xf32>, vector<8x128xf32> -> vector<8x128xf32>
    %6 = arith.addf %3, %5 : vector<8x128xf32>
    %c0_8 = arith.constant 0 : index
    %c0_9 = arith.constant 0 : index
    %7 = vector.load %arg5[%c0_8, %c0_9] : memref<1x128xf32, #tpu.memory_space<vmem>>, vector<1x128xf32>
    %8 = vector.broadcast %7 : vector<1x128xf32> to vector<8x128xf32>
    %9 = arith.addf %6, %8 : vector<8x128xf32>
    %cst_10 = arith.constant 5.000000e-01 : f32
    %10 = vector.broadcast %cst_10 : f32 to vector<8x128xf32>
    %11 = arith.mulf %10, %9 : vector<8x128xf32>
    %cst_11 = arith.constant 0.707106769 : f32
    %12 = vector.broadcast %cst_11 : f32 to vector<8x128xf32>
    %13 = arith.mulf %9, %12 : vector<8x128xf32>
    %cst_12 = arith.constant 0.000000e+00 : f32
    %14 = vector.broadcast %cst_12 : f32 to vector<8x128xf32>
    %15 = arith.cmpf olt, %13, %14 : vector<8x128xf32>
    %cst_13 = arith.constant -1.000000e+00 : f32
    %cst_14 = arith.constant 1.000000e+00 : f32
    %16 = vector.broadcast %cst_13 : f32 to vector<8x128xf32>
    %17 = vector.broadcast %cst_14 : f32 to vector<8x128xf32>
    %18 = arith.select %15, %16, %17 : vector<8x128xi1>, vector<8x128xf32>
    %19 = math.absf %13 : vector<8x128xf32>
    %cst_15 = arith.constant 0.327591091 : f32
    %20 = vector.broadcast %cst_15 : f32 to vector<8x128xf32>
    %21 = arith.mulf %20, %19 : vector<8x128xf32>
    %cst_16 = arith.constant 1.000000e+00 : f32
    %22 = vector.broadcast %cst_16 : f32 to vector<8x128xf32>
    %23 = arith.addf %22, %21 : vector<8x128xf32>
    %cst_17 = arith.constant 1.000000e+00 : f32
    %24 = vector.broadcast %cst_17 : f32 to vector<8x128xf32>
    %25 = arith.divf %24, %23 : vector<8x128xf32>
    %cst_18 = arith.constant 1.06140542 : f32
    %26 = vector.broadcast %cst_18 : f32 to vector<8x128xf32>
    %27 = arith.mulf %26, %25 : vector<8x128xf32>
    %cst_19 = arith.constant -1.45315206 : f32
    %28 = vector.broadcast %cst_19 : f32 to vector<8x128xf32>
    %29 = arith.addf %27, %28 : vector<8x128xf32>
    %30 = arith.mulf %29, %25 : vector<8x128xf32>
    %cst_20 = arith.constant 1.42141378 : f32
    %31 = vector.broadcast %cst_20 : f32 to vector<8x128xf32>
    %32 = arith.addf %30, %31 : vector<8x128xf32>
    %33 = arith.mulf %32, %25 : vector<8x128xf32>
    %cst_21 = arith.constant -0.284496725 : f32
    %34 = vector.broadcast %cst_21 : f32 to vector<8x128xf32>
    %35 = arith.addf %33, %34 : vector<8x128xf32>
    %36 = arith.mulf %35, %25 : vector<8x128xf32>
    %cst_22 = arith.constant 0.254829586 : f32
    %37 = vector.broadcast %cst_22 : f32 to vector<8x128xf32>
    %38 = arith.addf %36, %37 : vector<8x128xf32>
    %39 = arith.mulf %38, %25 : vector<8x128xf32>
    %cst_23 = arith.constant 0.000000e+00 : f32
    %40 = vector.broadcast %cst_23 : f32 to vector<8x128xf32>
    %41 = arith.subf %40, %19 : vector<8x128xf32>
    %42 = arith.mulf %41, %19 : vector<8x128xf32>
    %43 = math.exp %42 : vector<8x128xf32>
    %44 = arith.mulf %39, %43 : vector<8x128xf32>
    %cst_24 = arith.constant 1.000000e+00 : f32
    %45 = vector.broadcast %cst_24 : f32 to vector<8x128xf32>
    %46 = arith.subf %45, %44 : vector<8x128xf32>
    %47 = arith.mulf %18, %46 : vector<8x128xf32>
    %cst_25 = arith.constant 1.000000e+00 : f32
    %48 = vector.broadcast %cst_25 : f32 to vector<8x128xf32>
    %49 = arith.addf %48, %47 : vector<8x128xf32>
    %50 = arith.mulf %11, %49 : vector<8x128xf32>
    %c0_26 = arith.constant 0 : index
    %c0_27 = arith.constant 0 : index
    %51 = vector.load %arg6[%c0_26, %c0_27] : memref<1x128xf32, #tpu.memory_space<vmem>>, vector<1x128xf32>
    %52 = vector.broadcast %51 : vector<1x128xf32> to vector<8x128xf32>
    %53 = arith.mulf %50, %52 : vector<8x128xf32>
    %cst_28 = arith.constant dense<0.000000e+00> : vector<8xf32>
    %54 = vector.multi_reduction <add>, %53, %cst_28 [1] : vector<8x128xf32> to vector<8xf32>
    %55 = vector.shape_cast %54 : vector<8xf32> to vector<8x1xf32>
    %c0_29 = arith.constant 0 : index
    %c0_30 = arith.constant 0 : index
    %56 = vector.load %arg7[%c0_29, %c0_30] : memref<1x1xf32, #tpu.memory_space<vmem>>, vector<1x1xf32>
    %57 = vector.broadcast %56 : vector<1x1xf32> to vector<8x1xf32>
    %58 = arith.addf %55, %57 : vector<8x1xf32>
    %c0_31 = arith.constant 0 : index
    %c0_32 = arith.constant 0 : index
    %59 = vector.load %arg8[%c0_31, %c0_32] : memref<8x1xf32, #tpu.memory_space<vmem>>, vector<8x1xf32>
    tpu.vector_store %arg8[%c0_31, %c0_32], %58 {strides = array<i32>} : memref<8x1xf32, #tpu.memory_space<vmem>>, vector<8x1xf32>,
    return
  }
  func.func @transform_0(%arg0: i32) -> (i32, i32) {
    %c0_i32 = arith.constant 0 : i32
    %c0_i32_0 = arith.constant 0 : i32
    return %arg0, %c0_i32 : i32, i32
  }
  func.func @transform_1(%arg0: i32) -> (i32, i32) {
    %c0_i32 = arith.constant 0 : i32
    %c0_i32_0 = arith.constant 0 : i32
    return %arg0, %c0_i32 : i32, i32
  }
  func.func @transform_2(%arg0: i32) -> (i32, i32) {
    %c0_i32 = arith.constant 0 : i32
    %c0_i32_0 = arith.constant 0 : i32
    %c0_i32_1 = arith.constant 0 : i32
    return %c0_i32, %c0_i32_0 : i32, i32
  }
  func.func @transform_3(%arg0: i32) -> (i32, i32) {
    %c0_i32 = arith.constant 0 : i32
    %c0_i32_0 = arith.constant 0 : i32
    %c0_i32_1 = arith.constant 0 : i32
    return %c0_i32, %c0_i32_0 : i32, i32
  }
  func.func @transform_4(%arg0: i32) -> (i32, i32) {
    %c0_i32 = arith.constant 0 : i32
    %c0_i32_0 = arith.constant 0 : i32
    %c0_i32_1 = arith.constant 0 : i32
    return %c0_i32, %c0_i32_0 : i32, i32
  }
  func.func @transform_5(%arg0: i32) -> (i32, i32) {
    %c0_i32 = arith.constant 0 : i32
    %c0_i32_0 = arith.constant 0 : i32
    %c0_i32_1 = arith.constant 0 : i32
    return %c0_i32, %c0_i32_0 : i32, i32
  }
  func.func @transform_6(%arg0: i32) -> (i32, i32) {
    %c0_i32 = arith.constant 0 : i32
    %c0_i32_0 = arith.constant 0 : i32
    %c0_i32_1 = arith.constant 0 : i32
    return %c0_i32, %c0_i32_0 : i32, i32
  }
  func.func @transform_7(%arg0: i32) -> (i32, i32) {
    %c0_i32 = arith.constant 0 : i32
    %c0_i32_0 = arith.constant 0 : i32
    return %arg0, %c0_i32 : i32, i32
  }
}

</mosaic_0001>

<bundles_post_ra>
// kernel: discriminator_pallas.1
= control target key start
LH: loop header
LB: loop body
LE: loop exit
PB: predicated region body
PF: predicated region fallthrough
CT: control target
= control target key end

     0   :  { %vm65_vm0 = vcmask 1042432   ;;  %vm37_vm1 = vcmask 1045504   ;;  %vm33_vm2 = vcmask 48128   ;;  %vm61_vm3 = vcmask 89088   ;;  %s232_s2 = inlined_call_operand.vmem [shape: f32[11,128], index: 2, kind: input, shape index: {}]   ;;  %s233_s3 = inlined_call_operand.vmem [shape: f32[6,128], index: 3, kind: input, shape index: {}]   ;;  %s234_s1 = inlined_call_operand.vmem [shape: f32[8,6], index: 1, kind: input, shape index: {}]   ;;  %s235_s0 = inlined_call_operand.vmem [shape: f32[8,11], index: 0, kind: input, shape index: {}]   ;;  %s236_s4 = inlined_call_operand.vmem [shape: f32[1,128], index: 4, kind: input, shape index: {}]   ;;  %s237_s5 = inlined_call_operand.vmem [shape: f32[1,128], index: 5, kind: input, shape index: {}]   ;;  %s238_s6 = inlined_call_operand.<no memory space> [shape: f32[1,1], index: 6, kind: input, shape index: {}]   ;;  %s239_s7 = inlined_call_operand.vmem [shape: f32[8,1], index: 7, kind: output, shape index: {}]  }
   0x1   :  { %v31_v0 = vld [vmem:[%s232_s2 + $0x8] sm:$0x7]  ;;  %v32_v1 = vld [vmem:[%s233_s3] sm:$0x3f]  ;;  %v12_v23 = vstv %s238_s6  ;;  %v164_v40 = vmov 1.0   ;;  %vm146_vm9 = vcmask 7168  }
   0x2   :  { %v30_v2 = vld [vmem:[%s232_s2] sm:$0xff]  ;;  %154 = vmatpush.msk.msra.mxu1 %vm65_vm0, %v31_v0  ;;  %152 = vmatpush.msk.msra.mxu0 %vm37_vm1, %v32_v1  ;;  %13 = vst [vmem:[#allocation2] sm:$0x1] %v12_v23 }
   0x3   :  { %v29_v3 = vld [vmem:[%s234_s1] sm:$0xff] }
   0x4   :  { %v28_v4 = vld [vmem:[%s235_s0] sm:$0xff]  ;;  %153 = vmatmul.msk.f32.vlgmr.msra.gmra.mxu0 %vm33_vm2, %v29_v3  ;;  %84 = vmatpush.msra.mxu1 %v30_v2 }
   0x5   :  { %155 = vmatmul.msk.f32.vlgmr.msra.gmra.mxu1 %vm61_vm3, %v28_v4  ;;  %v157_v6 = vld [vmem:[%s236_s4] ss:$0 sm:$0xff] }
   0x6   :  { %v158_v45 = vld [vmem:[%s237_s5] ss:$0 sm:$0xff] }
   0x9   :  { %v159_v48 = vld [vmem:[#allocation2] ss:$0 sm:$0xff] }
  0x81   :  { %v58_v5 = vpop.f32.mrf.mxu0 }
  0x82   :  { %v86_v7 = vpop.f32.mrf.mxu1 }
  0x83   :  { %v87_v8 = vadd.f32 %v86_v7, %v58_v5 }
  0x85   :  { %v93_v9 = vadd.f32 %v157_v6, %v87_v8 }
  0x87   :  { %v95_v10 = vmul.f32 0.70710677, %v93_v9  ;;  %v94_v43 = vmul.f32 0.5, %v93_v9 }
  0x89   :  { %v98_v11 = vand.u32 2147483647, %v95_v10  ;;  %vm96_vm8 = vcmp.lt.f32.partialorder %v95_v10, 0.0 }
  0x8a   :  { %v97_v41 = vsel %vm96_vm8, -1.0, %v164_v40 }
  0x8b   :  { %v99_v12 = vmul.f32 0.3275911, %v98_v11  ;;  %v125_v24 = vsub.f32 0.0, %v98_v11 }
  0x8d   :  { %v100_v13 = vadd.f32 1.0, %v99_v12  ;;  %v126_v28 = vmul.f32 %v125_v24, %v98_v11 }
  0x8f   :  { %160 = vrcp.f32 %v100_v13  ;;  %v112_v17 = vand.u32 2147483648, %v100_v13  ;;  %v110_v19 = vand.u32 2147483647, %v100_v13  ;;  %vm106_vm5 = vweird.f32 %v100_v13 }
  0x90   :  { %v127_v31 = vmul.f32 1.442695, %v126_v28 }
  0x91   :  { %v113_v21 = vor.u32 1.1754944e-38, %v112_v17  ;;  %vm111_vm7 = vcmp.eq.f32.partialorder %v110_v19, 8.507059e+37 }
  0x92   :  { %162 = vpow2.f32 %v127_v31 }
  0x95   :  { %v161_v14 = vpop.eup %160 }
  0x96   :  { %v102_v15 = vmul.f32 %v161_v14, %v100_v13  ;;  %vm107_vm4 = vweird.f32 %v161_v14 }
  0x97   :  { %vm108_vm6 = vmor %vm106_vm5, %vm107_vm4 }
  0x98   :  { %v103_v16 = vsub.f32 1.0, %v102_v15  ;;  %v163_v37 = vpop.eup %162 }
  0x9a   :  { %v104_v18 = vmul.f32 %v161_v14, %v103_v16 }
  0x9c   :  { %v105_v20 = vadd.f32 %v161_v14, %v104_v18 }
  0x9e   :  { %v109_v22 = vsel %vm108_vm6, %v161_v14, %v105_v20 }
  0x9f   :  { %v114_v25 = vsel %vm111_vm7, %v113_v21, %v109_v22 }
  0xa0   :  { %v116_v26 = vmul.f32 1.0614054, %v114_v25 }
  0xa2   :  { %v117_v27 = vadd.f32 -1.4531521, %v116_v26 }
  0xa4   :  { %v118_v29 = vmul.f32 %v117_v27, %v114_v25 }
  0xa6   :  { %v119_v30 = vadd.f32 1.4214138, %v118_v29 }
  0xa8   :  { %v120_v32 = vmul.f32 %v119_v30, %v114_v25 }
  0xaa   :  { %v121_v33 = vadd.f32 -0.28449672, %v120_v32 }
  0xac   :  { %v122_v34 = vmul.f32 %v121_v33, %v114_v25 }
  0xae   :  { %v123_v35 = vadd.f32 0.2548296, %v122_v34 }
  0xb0   :  { %v124_v36 = vmul.f32 %v123_v35, %v114_v25 }
  0xb2   :  { %v129_v38 = vmul.f32 %v163_v37, %v124_v36 }
  0xb4   :  { %v130_v39 = vsub.f32 1.0, %v129_v38 }
  0xb6   :  { %v131_v42 = vmul.f32 %v130_v39, %v97_v41 }
  0xb8   :  { %v132_v44 = vadd.f32 1.0, %v131_v42 }
  0xba   :  { %v133_v46 = vmul.f32 %v132_v44, %v94_v43 }
  0xbc   :  { %v138_v47 = vmul.f32 %v158_v45, %v133_v46 }
  0xbe   :  { %139 = vadd.xlane.f32.xlu0 %v138_v47 }
 0x131   :  { %v140_v49 = vpop.xlane.xlu0 %139 }
 0x132   :  { %v145_v50 = vadd.f32 %v159_v48, %v140_v49 }
 0x134   :  { %147 = vst.msk [vmem:[%s239_s7] sm:$0xff] %vm146_vm9, %v145_v50 }

</bundles_post_ra>
